<compile_context>
chip_gen: v5e
topology: v5e:2x2
jax: 0.10.0
libtpu: 0.0.40
codegen_flags: <defaults>
</compile_context>

<pallas_src>
import math

import jax
import jax.numpy as jnp
from jax import lax
from jax.experimental import pallas as pl
from jax.experimental.pallas import tpu as pltpu


# ----------------------------- tiling helpers ------------------------------

_TM_MAX = 1024   # token (sublane) tile cap
_TN_MAX = 512    # per-head output tile cap
_TK_MAX = 1024   # contraction tile cap


def _round_up(x, m):
    return ((x + m - 1) // m) * m


def _pick_tile(dim, cap):
    """Use the full dim (no padding) when it fits under the cap, else the cap
    (a multiple of 8 and 128) plus padding up to a multiple of the cap."""
    if dim <= cap:
        return dim, dim
    return cap, _round_up(dim, cap)


def _maybe_pad(arr, target_shape):
    if tuple(arr.shape) == tuple(target_shape):
        return arr           # no-op: no HBM traffic
    pads = [(0, t - c) for c, t in zip(arr.shape, target_shape)]
    return jnp.pad(arr, pads)


def _vmem_limit_bytes(tm, tn, tk, in_itemsize, out_itemsize, multi_k):
    """Budget = double-buffered x/w/out tiles (+ f32 acc) + headroom, clamped
    to a generation-aware cap (v7x has only 64 MiB VMEM)."""
    need = 2 * (tm * tk + tn * tk) * in_itemsize
    need += 2 * tm * tn * out_itemsize
    if multi_k:
        need += tm * tn * 4
    need = int(need * 1.5) + (4 << 20)
    cap = 48 << 20
    try:
        phys = pltpu.get_tpu_info().vmem_capacity_bytes
        cap = min(96 << 20, (phys * 3) // 4)
    except Exception:
        pass
    return int(max(32 << 20, min(max(need, 32 << 20), cap)))


# ------------------------------- kernels -----------------------------------

def _make_kernel(has_bias, multi_k):
    """Unified per-head tile kernel.

    Refs (block shapes):
      x_ref: (1, tm, tk)   w_ref: (1, tn, tk)   b_ref: (1, 1, tn)
      o_ref: (1, tm, tn)   acc_ref (multi_k only): (tm, tn) f32
    Computes o[0] = x[0] @ w[0]^T (+ bias), contracting the last dims
    (transposed-RHS contraction: no in-kernel transpose).
    """

    def _dot(x_ref, w_ref):
        return lax.dot_general(
            x_ref[0], w_ref[0],
            dimension_numbers=(((1,), (1,)), ((), ())),
            preferred_element_type=jnp.float32,
        )

    if multi_k:
        if has_bias:
            def kernel(x_ref, w_ref, b_ref, o_ref, acc_ref):
                k = pl.program_id(3)
                nk = pl.num_programs(3)
                part = _dot(x_ref, w_ref)

                @pl.when(k == 0)
                def _():
                    acc_ref[...] = part                 # no zero-fill + add

                @pl.when(jnp.logical_and(k > 0, k < nk - 1))
                def _():
                    acc_ref[...] = acc_ref[...] + part

                @pl.when(k == nk - 1)                   # nk >= 2 here
                def _():
                    acc = acc_ref[...] + part + b_ref[0].astype(jnp.float32)
                    o_ref[0] = acc.astype(o_ref.dtype)
            return kernel

        def kernel(x_ref, w_ref, o_ref, acc_ref):
            k = pl.program_id(3)
            nk = pl.num_programs(3)
            part = _dot(x_ref, w_ref)

            @pl.when(k == 0)
            def _():
                acc_ref[...] = part

            @pl.when(jnp.logical_and(k > 0, k < nk - 1))
            def _():
                acc_ref[...] = acc_ref[...] + part

            @pl.when(k == nk - 1)
            def _():
                o_ref[0] = (acc_ref[...] + part).astype(o_ref.dtype)
        return kernel

    # Single K tile: no accumulator scratch, no init, straight store.
    if has_bias:
        def kernel(x_ref, w_ref, b_ref, o_ref):
            acc = _dot(x_ref, w_ref) + b_ref[0].astype(jnp.float32)
            o_ref[0] = acc.astype(o_ref.dtype)
        return kernel

    def kernel(x_ref, w_ref, o_ref):
        o_ref[0] = _dot(x_ref, w_ref).astype(o_ref.dtype)
    return kernel


# ------------------------------- wrapper ------------------------------------

def _run(x3, weight, bias, out_dtype, per_head_x):
    """x3: (Hx, N, d_in) where Hx == parallel_no (per-head x) or Hx == 1
    (x shared across heads).  Returns (parallel_no, N, d_out)."""
    H, d_out, d_in = weight.shape
    N = x3.shape[1]

    tm, m_pad = _pick_tile(N, _TM_MAX)
    tk, k_pad = _pick_tile(d_in, _TK_MAX)
    tn, n_pad = _pick_tile(d_out, _TN_MAX)

    # Padding only materializes when a dim exceeds its tile cap.
    x_p = _maybe_pad(x3, (x3.shape[0], m_pad, k_pad))
    w_p = _maybe_pad(weight, (H, n_pad, k_pad))

    has_bias = bias is not None
    k_tiles = k_pad // tk
    multi_k = k_tiles > 1

    if per_head_x:
        x_map = lambda i, h, j, k: (h, i, k)
    else:
        x_map = lambda i, h, j, k: (0, i, k)

    args = [x_p, w_p]
    in_specs = [
        pl.BlockSpec((1, tm, tk), x_map),
        pl.BlockSpec((1, tn, tk), lambda i, h, j, k: (h, j, k)),
    ]
    if has_bias:
        b_p = _maybe_pad(bias, (H, 1, n_pad))
        args.append(b_p)
        in_specs.append(pl.BlockSpec((1, 1, tn), lambda i, h, j, k: (h, 0, j)))

    # Large M-tile axis leads so v7x megacore splits an even axis; K last.
    grid = (m_pad // tm, H, n_pad // tn, k_tiles)

    scratch_shapes = [pltpu.VMEM((tm, tn), jnp.float32)] if multi_k else []

    vmem_limit = _vmem_limit_bytes(
        tm, tn, tk, x_p.dtype.itemsize, jnp.dtype(out_dtype).itemsize, multi_k)

    out = pl.pallas_call(
        _make_kernel(has_bias, multi_k),
        out_shape=jax.ShapeDtypeStruct((H, m_pad, n_pad), out_dtype),
        grid_spec=pltpu.PrefetchScalarGridSpec(
            num_scalar_prefetch=0,
            grid=grid,
            in_specs=in_specs,
            out_specs=pl.BlockSpec((1, tm, tn), lambda i, h, j, k: (h, i, j)),
            scratch_shapes=scratch_shapes,
        ),
        compiler_params=pltpu.CompilerParams(
            dimension_semantics=("parallel", "parallel", "parallel", "arbitrary"),
            vmem_limit_bytes=vmem_limit,
        ),
    )(*args)

    if m_pad != N or n_pad != d_out:
        out = out[:, :N, :d_out]
    return out


def multihead_linear(x, weight, bias=None, compute_dtype=None):
    """Pallas implementation of MultiheadLinear.forward.

    x:      (N, d_in) or (1, N, d_in) or (parallel_no, N, d_in)
    weight: (parallel_no, d_out, d_in)
    bias:   (parallel_no, 1, d_out) or None
    compute_dtype: optional (e.g. jnp.bfloat16) — cast x/W for the MXU while
                   keeping f32 accumulation and an f32 bias add.
    returns (parallel_no, N, d_out)
    """
    parallel_no, d_out, d_in = weight.shape
    out_dtype = jnp.result_type(x.dtype, weight.dtype)

    if compute_dtype is not None:
        x = x.astype(compute_dtype)
        weight = weight.astype(compute_dtype)

    if x.ndim == 2:
        assert x.shape[1] == d_in
        return _run(x[None], weight, bias, out_dtype, per_head_x=False)
    if x.ndim == 3:
        assert x.shape[2] == d_in
        if x.shape[0] == 1:
            # torch path: squeeze(0) -> shared across heads
            return _run(x, weight, bias, out_dtype, per_head_x=False)
        if x.shape[0] != parallel_no:
            raise ValueError("leading dim of 3D x must be 1 or parallel_no")
        return _run(x, weight, bias, out_dtype, per_head_x=True)
    raise ValueError("x must be 2D or 3D")


# --------------------------- init / reference -------------------------------

def init_multihead_linear_params(key, d_in, d_out, parallel_no, add_bias=True,
                                 same_weight_init=False):
    """Deterministic init mirroring kaiming_uniform_(a=sqrt(5)) + uniform bias."""
    kw, kb = jax.random.split(key)
    bound = 1.0 / math.sqrt(d_in)
    weight = jax.random.uniform(
        kw, (parallel_no, d_out, d_in), minval=-bound, maxval=bound,
        dtype=jnp.float32)
    if same_weight_init:
        weight = jnp.broadcast_to(weight[0:1], weight.shape)

    if add_bias:
        bias = jax.random.uniform(
            kb, (parallel_no, 1, d_out), minval=-bound, maxval=bound,
            dtype=jnp.float32)
        if same_weight_init:
            bias = jnp.broadcast_to(bias[0:1], bias.shape)
    else:
        bias = None
    return weight, bias


def _reference(x, weight, bias):
    if x.ndim == 2:
        r = jnp.einsum('ik,bjk->bij', x, weight)
    else:
        if x.shape[0] == 1:
            r = jnp.einsum('ik,bjk->bij', x[0], weight)
        else:
            r = jnp.einsum('bik,bjk->bij', x, weight)
    if bias is not None:
        r = r + bias
    return r


# --------------------------------- main --------------------------------------

if __name__ == "__main__":
    key = jax.random.PRNGKey(0)
    k_param, k_x2, k_x3, k_xk, k_wk = jax.random.split(key, 5)

    d_in, d_out, parallel_no = 32, 32, 4
    N = 8

    weight, bias = init_multihead_linear_params(
        k_param, d_in, d_out, parallel_no, add_bias=True)

    # Case 1: 2D input (shared across heads), with bias — single-K kernel.
    x2 = jax.random.normal(k_x2, (N, d_in), dtype=jnp.float32)
    out2 = jax.block_until_ready(multihead_linear(x2, weight, bias))
    ref2 = _reference(x2, weight, bias)
    assert out2.shape == (parallel_no, N, d_out)
    assert jnp.allclose(out2, ref2, atol=1e-5, rtol=1e-5)

    # Case 2: 3D input, batch == parallel_no (per-head inputs), with bias.
    x3 = jax.random.normal(k_x3, (parallel_no, N, d_in), dtype=jnp.float32)
    out3 = jax.block_until_ready(multihead_linear(x3, weight, bias))
    ref3 = _reference(x3, weight, bias)
    assert out3.shape == (parallel_no, N, d_out)
    assert jnp.allclose(out3, ref3, atol=1e-5, rtol=1e-5)

    # Case 3: 3D input with leading dim 1 (squeeze path), no bias.
    x31 = x2[None]
    out31 = jax.block_until_ready(multihead_linear(x31, weight, None))
    ref31 = _reference(x31, weight, None)
    assert out31.shape == (parallel_no, N, d_out)
    assert jnp.allclose(out31, ref31, atol=1e-5, rtol=1e-5)

    # Case 4: batched, no bias (bias-less kernel variant).
    out4 = jax.block_until_ready(multihead_linear(x3, weight, None))
    ref4 = _reference(x3, weight, None)
    assert jnp.allclose(out4, ref4, atol=1e-5, rtol=1e-5)

    # Case 5: d_in larger than the K tile cap — exercises the multi-K
    # accumulator kernel (K grid axis of size 2).
    big_k = 2 * _TK_MAX
    w_big = jax.random.uniform(k_wk, (parallel_no, d_out, big_k),
                               minval=-1.0 / math.sqrt(big_k),
                               maxval=1.0 / math.sqrt(big_k), dtype=jnp.float32)
    x_big = jax.random.normal(k_xk, (N, big_k), dtype=jnp.float32)
    out5 = jax.block_until_ready(multihead_linear(x_big, w_big, bias))
    ref5 = _reference(x_big, w_big, bias)
    assert jnp.allclose(out5, ref5, atol=1e-4, rtol=1e-4)

    # Case 6: bf16 compute mode (f32 accumulation), loose tolerance.
    out6 = jax.block_until_ready(
        multihead_linear(x2, weight, bias, compute_dtype=jnp.bfloat16))
    assert out6.shape == (parallel_no, N, d_out)
    assert jnp.allclose(out6, ref2, atol=1e-1, rtol=5e-2)

    print("KERNEL_OK")
</pallas_src>

<mosaic_0001>
module attributes {stable_mosaic.version = 11 : i64} {
  func.func @kernel(%arg0: i32, %arg1: i32, %arg2: i32, %arg3: i32, %arg4: memref<1x8x32xf32, #tpu.memory_space<vmem>>, %arg5: memref<1x32x32xf32, #tpu.memory_space<vmem>>, %arg6: memref<1x1x32xf32, #tpu.memory_space<vmem>>, %arg7: memref<1x8x32xf32, #tpu.memory_space<vmem>>) attributes {dimension_semantics = [#tpu.dimension_semantics<parallel>, #tpu.dimension_semantics<parallel>, #tpu.dimension_semantics<parallel>, #tpu.dimension_semantics<arbitrary>], iteration_bounds = array<i64: 1, 4, 1, 1>, scalar_prefetch = 0 : i64, scratch_operands = 0 : i64, tpu.core_type = #tpu.core_type<tc>, window_params = [{transform_indices = @transform_0, window_bounds = array<i64: 1, 8, 32>}, {transform_indices = @transform_1, window_bounds = array<i64: 1, 32, 32>}, {transform_indices = @transform_2, window_bounds = array<i64: 1, 1, 32>}, {transform_indices = @transform_3, window_bounds = array<i64: 1, 8, 32>}]} {
    %c0 = arith.constant 0 : index
    %c0_0 = arith.constant 0 : index
    %c0_1 = arith.constant 0 : index
    %0 = vector.load %arg4[%c0, %c0_0, %c0_1] : memref<1x8x32xf32, #tpu.memory_space<vmem>>, vector<1x8x32xf32>
    %1 = vector.shape_cast %0 : vector<1x8x32xf32> to vector<8x32xf32>
    %c0_2 = arith.constant 0 : index
    %c0_3 = arith.constant 0 : index
    %c0_4 = arith.constant 0 : index
    %2 = vector.load %arg5[%c0_2, %c0_3, %c0_4] : memref<1x32x32xf32, #tpu.memory_space<vmem>>, vector<1x32x32xf32>
    %3 = vector.shape_cast %2 : vector<1x32x32xf32> to vector<32x32xf32>
    %cst = arith.constant dense<0.000000e+00> : vector<8x32xf32>
    %4 = tpu.matmul %1, %3, %cst {dimension_numbers = #tpu.dot_dimension_numbers<[1], [1], [0], [0], [0, 0, 1, 0], [], []>} : vector<8x32xf32>, vector<32x32xf32>, vector<8x32xf32> -> vector<8x32xf32>
    %c0_5 = arith.constant 0 : index
    %c0_6 = arith.constant 0 : index
    %c0_7 = arith.constant 0 : index
    %5 = vector.load %arg6[%c0_5, %c0_6, %c0_7] : memref<1x1x32xf32, #tpu.memory_space<vmem>>, vector<1x1x32xf32>
    %6 = vector.shape_cast %5 : vector<1x1x32xf32> to vector<1x32xf32>
    %7 = vector.broadcast %6 : vector<1x32xf32> to vector<8x32xf32>
    %8 = arith.addf %4, %7 : vector<8x32xf32>
    %c0_8 = arith.constant 0 : index
    %c0_9 = arith.constant 0 : index
    %c0_10 = arith.constant 0 : index
    %9 = vector.load %arg7[%c0_8, %c0_9, %c0_10] : memref<1x8x32xf32, #tpu.memory_space<vmem>>, vector<1x8x32xf32>
    %10 = vector.shape_cast %9 : vector<1x8x32xf32> to vector<8x32xf32>
    %11 = vector.shape_cast %8 : vector<8x32xf32> to vector<1x8x32xf32>
    tpu.vector_store %arg7[%c0_8, %c0_9, %c0_10], %11 {strides = array<i32>} : memref<1x8x32xf32, #tpu.memory_space<vmem>>, vector<1x8x32xf32>,
    return
  }
  func.func @transform_0(%arg0: i32, %arg1: i32, %arg2: i32, %arg3: i32) -> (i32, i32, i32) {
    %c0_i32 = arith.constant 0 : i32
    %c0_i32_0 = arith.constant 0 : i32
    return %c0_i32, %arg0, %arg3 : i32, i32, i32
  }
  func.func @transform_1(%arg0: i32, %arg1: i32, %arg2: i32, %arg3: i32) -> (i32, i32, i32) {
    %c0_i32 = arith.constant 0 : i32
    return %arg1, %arg2, %arg3 : i32, i32, i32
  }
  func.func @transform_2(%arg0: i32, %arg1: i32, %arg2: i32, %arg3: i32) -> (i32, i32, i32) {
    %c0_i32 = arith.constant 0 : i32
    %c0_i32_0 = arith.constant 0 : i32
    return %arg1, %c0_i32, %arg2 : i32, i32, i32
  }
  func.func @transform_3(%arg0: i32, %arg1: i32, %arg2: i32, %arg3: i32) -> (i32, i32, i32) {
    %c0_i32 = arith.constant 0 : i32
    return %arg1, %arg0, %arg2 : i32, i32, i32
  }
}

</mosaic_0001>

<bundles_post_ra>
// kernel: tpu_custom_call.1
= control target key start
LH: loop header
LB: loop body
LE: loop exit
PB: predicated region body
PF: predicated region fallthrough
CT: control target
= control target key end

     0   :  { %8 = vsyncpa [#allocation3], 0  ;;  %s957_s0 = inlined_call_operand.hbm [shape: f32[1,8,32], index: 0, kind: input, shape index: {}]   ;;  %s958_s1 = inlined_call_operand.hbm [shape: f32[4,32,32], index: 1, kind: input, shape index: {}]   ;;  %s959_s2 = inlined_call_operand.hbm [shape: f32[4,1,32], index: 2, kind: input, shape index: {}]   ;;  %s960_s3 = inlined_call_operand.hbm [shape: f32[4,8,32], index: 3, kind: output, shape index: {}]  }
   0x1   :  { %9 = vsyncpa [#allocation6], 0 }
   0x2   :  { %11 = vsyncpa [#allocation6 + $0x1], 0 }
   0x3   :  { %12 = vsyncpa [#allocation4], 0 }
   0x4   :  { %14 = vsyncpa [#allocation4 + $0x1], 0  ;;  %s779_s12 = smov 0   ;;  %s781_s13 = smov 0  }
   0x5   :  { %s783_s14 = smov 0   ;;  %s785_s15 = smov 0  }
   0x6   :  { %s787_s16 = smov 0   ;;  %s789_s17 = smov 0  }
   0x7 LB: > { %s42_s18 = sadd.s32 1, %s750_s16  ;;  %s85_s19 = sadd.s32 1, %s742_s14  ;;  %s754_s17 = sphi %s789_s17, %s20_s17   ;;  %s750_s16 = sphi %s787_s16, %s971_s16   ;;  %s746_s15 = sphi %s785_s15, %s970_s15   ;;  %s742_s14 = sphi %s783_s14, %s969_s14   ;;  %s738_s13 = sphi %s781_s13, %s968_s13   ;;  %s734_s12 = sphi %s779_s12, %s967_s12  }
   0x8   : > { %p44_p0 = scmp.ge.s32.totalorder %s42_s18, 4  ;;  %p92_p1 = scmp.ne.s32.totalorder %s742_s14, %s738_s13 }
   0x9   : > { %p93_p2 = scmp.eq.s32.totalorder %s754_s17, 0  ;;  %p523_p4 = scmp.lt.s32.totalorder %s754_s17, 4 }
   0xa   : > { %s973_s18 = smov (%p44_p0, %s42_s18), 0  ;;  %s195_s22 = sand.u32 1, %s754_s17  }
   0xb   : > { %p819_p3 = por %p93_p2, %p92_p1  ;;  %s78_s21 = ssub.s32 %s750_s16, %s973_s18 }
   0xc   : > { %p83_p5 = scmp.eq.s32.totalorder %s78_s21, 0  ;;  %s197_s23 = sand.u32 1, %s742_s14  }
   0xd   : > { %s496_s24 = sshll.u32 %s750_s16, 5  ;;  %s480_s26 = sshll.u32 %s197_s23, 5 }
   0xe   : > { %s830_s25 = scalar_select %p83_p5, %s742_s14, %s85_s19  }
   0xf   : > { %s207_s29 = scalar_lea.hbm %s958_s1, %s496_s24  ;;  %s199_s4 = scalar_lea.vmem [#allocation5], %s480_s26 }
  0x10   : > { %s208_s30 = sshll.u32 %s207_s29, 4  ;;  %s210_s5 = sshll.u32 %s199_s4, 4  ;;  %s209_s30 = int_to_ptr.hbm [resolvable:$true] %s208_s30  ;;  %s211_s5 = int_to_ptr.vmem [resolvable:$true] %s210_s5 }
  0x11   : > { %p841_p6 = pnand %p523_p4, %p819_p3  ;;  %s845_s7 = scalar_lea.sflag [#allocation6], %s195_s22 }
  0x12   : > { %s756_s8 = smov 128   ;;  %s757_s9 = smov 8  }
  0x13   : > { %514 = dma.hbm_to_vmem [thread:$0]  (!%p841_p6), %s209_s30, 512, %s211_s5, %s845_s7, %s756_s8, %s756_s8, %s757_s9  }
  0x14   : > { %s851_s10 = sadd.s32 4294967295, %s754_s17   ;;  %s476_s11 = sadd.s32 4294967294, %s754_s17  }
  0x15   : > { %p98_p7 = scmp.ne.s32.totalorder %s738_s13, %s734_s12  ;;  %p99_p8 = scmp.eq.s32.totalorder %s851_s10, 0 }
  0x16   : > { %p154_p9 = scmp.eq.s32.totalorder %s851_s10, 3  ;;  %p160_p10 = scmp.eq.s32.totalorder %s476_s11, 3 }
  0x17   : > { %p477_p11 = scmp.ge.s32.totalorder %s754_s17, 1  ;;  %p861_p12 = por %p99_p8, %p98_p7 }
  0x18   : > { %p868_p13 = por %p154_p9, %p92_p1  ;;  %p872_p0 = por %p160_p10, %p98_p7 }
  0x19   : > { %p167_p2 = scmp.lt.s32.totalorder %s754_s17, 5  ;;  %s182_s26 = sshll.u32 %s957_s0, 4  ;;  %s183_s26 = int_to_ptr.hbm [resolvable:$true] %s182_s26 }
  0x1a   : > { %s758_s28 = smov [#allocation2]   ;;  %s227_s5 = scalar_lea.hbm %s959_s2, %s750_s16 }
  0x1b   : > { %p880_p3 = pnand %p477_p11, %p167_p2  ;;  %s184_s29 = sshll.u32 %s758_s28, 4  ;;  %s185_s29 = int_to_ptr.vmem [resolvable:$true] %s184_s29 }
  0x1c   : > { %s229_s8 = sshll.u32 %s227_s5, 4  ;;  %s223_s9 = scalar_lea.vmem [#allocation7], %s197_s23  ;;  %s230_s8 = int_to_ptr.hbm [resolvable:$true] %s229_s8 }
  0x1d   : > { %p507_p1 = pneg %p880_p3  ;;  %s231_s11 = sshll.u32 %s223_s9, 4  ;;  %s232_s11 = int_to_ptr.vmem [resolvable:$true] %s231_s11 }
  0x1e   : > { %517 = dma.hbm_to_vmem [thread:$0]  (!%p841_p6), %s230_s8, 16, %s232_s11, %s845_s7  }
  0x1f   : > { %p508_p4 = pnand %p507_p1, %p99_p8  ;;  %240 = sbr.rel (%p880_p3) target bundleno = 188 (0xbc), region = 32 }
  0x21   : > { %510 = dma.hbm_to_vmem [thread:$0]  (!%p508_p4), %s183_s26, 128, %s185_s29, [#allocation3]  }
  0x24   : > { %721 = dma.done.wait (%p99_p8), [#allocation3], 128  }
  0x25   : > { %723 = vsyncadd (%p99_p8), [#allocation3], 4294967168  ;;  %s247_s22 = sand.u32 1, %s851_s10   ;;  %s905_s24 = sand.u32 1, %s738_s13  }
  0x26   : > { %s485_s23 = sshll.u32 %s905_s24, 5  ;;  %s248_s26 = scalar_lea.sflag [#allocation6], %s247_s22 }
  0x27   : > { %s251_s6 = scalar_lea.vmem [#allocation5], %s485_s23 }
  0x28   : > { %725 = dma.done.wait (%p861_p12), %s248_s26, 528  }
  0x29   : > { %727 = vsyncadd (%p861_p12), %s248_s26, 4294966768  ;;  %vm298_vm0 = vcmask 261120   ;;  %v293_v0 = vld [vmem:[%s251_s6 + $0x18] sm:$0xff]  ;;  %s260_s7 = scalar_lea.vmem [#allocation7], %s905_s24  ;;  %v292_v1 = vld [vmem:[%s251_s6 + $0x10] sm:$0xff]  ;;  %s486_s10 = sshll.u32 %s905_s24, 3 }
  0x2a   : > { %487 = vmatpush.xpose.msk.msra.mxu0 %vm298_vm0, %v293_v0  ;;  %v291_v2 = vld [vmem:[%s251_s6 + $0x8] sm:$0xff]  ;;  %v290_v3 = vld [vmem:[%s251_s6] sm:$0xff]  ;;  %v289_v4 = vld [vmem:[#allocation2] sm:$0xff]  ;;  %s493_s19 = sshll.u32 %s746_s15, 3  ;;  %s287_s30 = scalar_lea.vmem [#allocation8], %s486_s10 }
  0x2b   : > { %s348_s29 = scalar_lea.hbm %s960_s3, %s493_s19  ;;  %v577_v5 = vld [vmem:[%s260_s7] ss:$0 sm:$0xff]  ;;  %s350_s4 = sshll.u32 %s287_s30, 4  ;;  %s351_s4 = int_to_ptr.vmem [resolvable:$true] %s350_s4 }
  0x2c   : > { %s352_s5 = sshll.u32 %s348_s29, 4  ;;  %s336_s8 = scalar_lea.sflag [#allocation4], %s905_s24  ;;  %s353_s5 = int_to_ptr.hbm [resolvable:$true] %s352_s5 }
  0x2d   : > { %s682_s9 = sshra.s32 %s353_s5, 4  ;;  %s688_s23 = scalar_lea.hbm %s960_s3, 32  ;;  %s683_s9 = int_to_ptr.hbm [resolvable:$true] %s682_s9 }
  0x2e   : > { %488 = vmatpush.xpose.msk.msra.mxu0 %vm298_vm0, %v292_v1  ;;  %s684_s11 = scalar_lea.hbm %s683_s9, 8  ;;  %p689_p8 = scmp.lt.s32.totalorder %s683_s9, %s960_s3 }
  0x2f   : > { %p685_p5 = scmp.ne.s32.totalorder %s683_s9, %s684_s11  ;;  %p690_p9 = scmp.lt.s32.totalorder %s688_s23, %s684_s11 }
  0x31   : > { %p686_p6 = pnand %p685_p5, %p868_p13  ;;  %p691_p10 = por %p690_p9, %p689_p8 }
  0x32   : > { %489 = vmatpush.xpose.msk.msra.mxu0 %vm298_vm0, %v291_v2 }
  0x33   : > { %p687_p7 = pneg %p686_p6 }
  0x35   : > { %p692_p11 = pnand %p691_p10, %p687_p7 }
  0x36   : > { %490 = vmatpush.xpose.msk.msra.mxu0 %vm298_vm0, %v290_v3 }
  0x39   : > { %491 = vmatmul.msk.f32.vlgmr.msra.gmra.mxu0 %vm298_vm0, %v289_v4 }
  0xb6   : > { %v331_v6 = vpop.f32.mrf.mxu0 }
  0xb7   : > { %v332_v7 = vadd.f32 %v577_v5, %v331_v6 }
  0xb9   : > { %334 = vst.msk [vmem:[%s287_s30] sm:$0xff] %vm298_vm0, %v332_v7 }
  0xba   : > { %695 = shalt.err (!%p692_p11)
}
  0xbb   : > { %505 = dma.vmem_to_hbm [thread:$0]  (%p868_p13), %s351_s4, 128, %s353_s5, %s336_s8  }
  0xbc PF: > { %p525_p12 = scmp.ge.s32.totalorder %s754_s17, 2  ;;  %s364_s24 = sand.u32 1, %s734_s12  }
  0xbd   : > { %s365_s7 = scalar_lea.sflag [#allocation4], %s364_s24 }
  0xbe   : > { %p519_p2 = pnand %p525_p12, %p872_p0 }
  0xc0   : > { %p520_p3 = pneg %p519_p2 }
  0xc2   : > { %729 = dma.done.wait (%p520_p3), %s365_s7, 128  }
  0xc3   : > { %731 = vsyncadd (%p520_p3), %s365_s7, 4294967168  ;;  %s20_s17 = sadd.s32 1, %s754_s17   ;;  %s967_s12 = smov %s738_s13 }
  0xc4   : > { %p17_p1 = scmp.ge.s32.totalorder %s20_s17, 6   ;;  %s968_s13 = smov %s742_s14 }
  0xc5   : > { %s969_s14 = smov %s830_s25  ;;  %s970_s15 = smov %s750_s16 }
  0xc6   : > { %s971_s16 = smov %s973_s18  ;;  %19 = sbr.rel (!%p17_p1) target bundleno = 7 (0x7), region = 94 }
  0xcb   :  { %371 = vsyncpa [#allocation3], 1 }
  0xcc   :  { %373 = vsyncpa [#allocation3 + $0x1], 1 }
  0xcd   :  { %374 = vsyncpa [#allocation6], 1 }
  0xce   :  { %376 = vsyncpa [#allocation6 + $0x1], 1 }
  0xcf   :  { %377 = vsyncpa [#allocation4], 1 }
  0xd0   :  { %379 = vsyncpa [#allocation4 + $0x1], 1 }

</bundles_post_ra>
